<compile_context>
chip_gen: v5e
topology: v5e:2x2
jax: 0.10.0
libtpu: 0.0.40
codegen_flags: <defaults>
</compile_context>

<pallas_src>
import functools

import jax
import jax.numpy as jnp
from jax.experimental import pallas as pl
from jax.experimental.pallas import tpu as pltpu

BN_EPS = 1e-5
L2_EPS = 1e-12


def _round_up(x, m):
    return ((x + m - 1) // m) * m


def _vmem_capacity_bytes():
    try:
        info = pltpu.get_tpu_info()
        cap = getattr(info, "vmem_capacity_bytes", None)
        if cap:
            return int(cap)
    except Exception:
        pass
    return 64 * 1024 * 1024  # conservative (v7x) fallback


# ---------------------------------------------------------------------------
# Kernel bodies
# ---------------------------------------------------------------------------
def _geu_tail(h, w2, b2, out_dtype, normalize):
    """h -> ContextGating(+folded BN) -> GLU -> optional L2 normalize."""
    h1 = jnp.dot(h.astype(w2.dtype), w2, preferred_element_type=jnp.float32) + b2
    y = h * jax.nn.sigmoid(h1)            # GLU(cat([h, h1], 1), 1)
    if normalize:
        # F.normalize(dim=-1): clamp squared norm at eps^2, rsqrt on the EUP.
        sumsq = jnp.sum(y * y, axis=-1, keepdims=True)
        y = y * jax.lax.rsqrt(jnp.maximum(sumsq, L2_EPS * L2_EPS))
    return y.astype(out_dtype)


def _geu_kernel_single(x_ref, w1_ref, w2_ref, bias_ref, o_ref, *, normalize):
    # Full Din in one shot. Cast x in-kernel (VPU, hidden under MXU/DMA).
    bias = bias_ref[...]                  # (2, Dout_p) f32
    h = jnp.dot(x_ref[...].astype(w1_ref.dtype), w1_ref[...],
                preferred_element_type=jnp.float32) + bias[0:1, :]
    o_ref[...] = _geu_tail(h, w2_ref[...], bias[1:2, :], o_ref.dtype, normalize)


def _geu_kernel_multi(x_ref, w1_ref, w2_ref, bias_ref, o_ref, acc_ref, *, normalize):
    # Din tiled along grid axis 1 ("arbitrary"); f32 accumulator scratch.
    k = pl.program_id(1)

    @pl.when(k == 0)
    def _():
        acc_ref[...] = jnp.zeros_like(acc_ref)

    acc_ref[...] += jnp.dot(x_ref[...].astype(w1_ref.dtype), w1_ref[...],
                            preferred_element_type=jnp.float32)

    @pl.when(k == pl.num_programs(1) - 1)
    def _():
        bias = bias_ref[...]
        h = acc_ref[...] + bias[0:1, :]
        o_ref[...] = _geu_tail(h, w2_ref[...], bias[1:2, :], o_ref.dtype, normalize)


# ---------------------------------------------------------------------------
# One-time (per checkpoint) weight preparation
# ---------------------------------------------------------------------------
def prepare_geu_params(params, *, use_bn=True, compute_dtype=jnp.bfloat16):
    """Fold eval-mode BatchNorm into W2/b2, pack biases, lane-pad dout to a
    multiple of 128, and cast weights to the MXU compute dtype.  Call once per
    checkpoint and reuse across gated_embedding_unit() calls."""
    din, dout = params["w1"].shape
    w1 = params["w1"].astype(jnp.float32)
    b1 = params["b1"].reshape(1, dout).astype(jnp.float32)
    w2 = params["w2"].astype(jnp.float32)
    b2 = params["b2"].reshape(1, dout).astype(jnp.float32)

    if use_bn:
        # TODO(synk): training-mode BatchNorm1d (batch stats + running-stat
        # update) is not implemented; eval-mode running stats assumed.
        gamma = params["gamma"].reshape(1, dout).astype(jnp.float32)
        beta = params["beta"].reshape(1, dout).astype(jnp.float32)
        mean = params["mean"].reshape(1, dout).astype(jnp.float32)
        var = params["var"].reshape(1, dout).astype(jnp.float32)
        scale = gamma * jax.lax.rsqrt(var + BN_EPS)        # (1, dout)
        w2 = w2 * scale                                    # scale output columns
        b2 = (b2 - mean) * scale + beta

    # Lane-pad the output dim so every output store is an unmasked, lane-dense
    # vst.  Padded columns provably stay 0 through the whole pipeline
    # (zero W1 cols + zero b1 -> h_pad = 0; zero W2 rows/cols + zero b2 ->
    #  h1_pad = 0; y_pad = 0 * sigmoid(0) = 0), so the L2 norm is unaffected.
    dout_p = max(_round_up(dout, 128), 128)
    if dout_p != dout:
        pad = dout_p - dout
        w1 = jnp.pad(w1, ((0, 0), (0, pad)))
        w2 = jnp.pad(w2, ((0, pad), (0, pad)))
        b1 = jnp.pad(b1, ((0, 0), (0, pad)))
        b2 = jnp.pad(b2, ((0, 0), (0, pad)))

    bias = jnp.concatenate([b1, b2], axis=0)               # (2, dout_p) f32
    return {
        "w1": w1.astype(compute_dtype),                    # (din,  dout_p)
        "w2": w2.astype(compute_dtype),                    # (dout_p, dout_p)
        "bias": bias,
        "din": din,
        "dout": dout,
        "dout_p": dout_p,
    }


# ---------------------------------------------------------------------------
# Pallas call wrapper
# ---------------------------------------------------------------------------
def gated_embedding_unit(x, prepared, *, normalize=True, tile_b=None, out_dtype=None):
    """x: (N, input_dim).  prepared: output of prepare_geu_params."""
    n, din = x.shape
    assert din == prepared["din"], "input_dim mismatch vs prepared weights"
    w1, w2, bias = prepared["w1"], prepared["w2"], prepared["bias"]
    dout, dout_p = prepared["dout"], prepared["dout_p"]
    out_dtype = out_dtype or x.dtype

    c_bytes = jnp.dtype(w1.dtype).itemsize
    x_bytes = jnp.dtype(x.dtype).itemsize
    o_bytes = jnp.dtype(out_dtype).itemsize

    cap = _vmem_capacity_bytes()
    budget = int(cap * 0.75)

    # ---- Din (reduction) tiling only if W1 alone would blow the VMEM budget ----
    tk = din
    if din * dout_p * c_bytes > budget // 3:
        for cand in (4096, 2048, 1024, 512, 256, 128):
            if din % cand == 0 and cand * dout_p * c_bytes <= budget // 3:
                tk = cand
                break
        # TODO(synk): if din is huge and has no nice divisor, fall back to the
        # full-Din block (may spill); zero-padding din would need an x pad pass.
    nk = pl.cdiv(din, tk)

    # ---- batch tile: biggest that fits, intermediates included in the estimate ----
    def footprint(tb):
        return ((1 if nk == 1 else 2) * tk * dout_p * c_bytes   # W1 buffer(s)
                + dout_p * dout_p * c_bytes                     # W2 (single-buffered)
                + 8 * max(dout_p, 128) * 4                      # bias (sublane/lane padded)
                + 2 * tb * tk * x_bytes                         # x tiles (double)
                + 2 * tb * dout_p * o_bytes                     # out tiles (double)
                + (tb * dout_p * 4 if nk > 1 else 0)            # f32 acc scratch
                + 4 * tb * dout_p * 4)                          # f32 temps (h, h1, y, h_bf16)

    cands = (1024, 512, 256, 128, 64, 32, 16)
    if tile_b is not None:
        cands = tuple(c for c in cands if c <= tile_b) or (16,)
    tb = 16
    for c in cands:
        if footprint(c) <= budget:
            tb = c
            break
    tb = min(tb, _round_up(n, 16))          # bf16 sublane tile is (16, 128)
    # Keep >= 2 batch grid steps when possible so v7x's two TensorCores both work.
    if n >= 32 and pl.cdiv(n, tb) < 2:
        tb = _round_up(pl.cdiv(n, 2), 16)
    nb = pl.cdiv(n, tb)                     # ragged last block is clipped by Pallas

    vmem_limit = int(min(max(2 * footprint(tb), 32 * 1024 * 1024), int(cap * 0.9)))

    cost = pl.CostEstimate(
        flops=2 * n * dout_p * (din + dout_p),
        transcendentals=n * dout_p + n,                     # sigmoid + rsqrt
        bytes_accessed=(n * din * x_bytes + din * dout_p * c_bytes
                        + dout_p * dout_p * c_bytes + 2 * dout_p * 4
                        + n * dout_p * o_bytes),
    )

    if nk == 1:
        kernel = functools.partial(_geu_kernel_single, normalize=normalize)
        scratch = []
        w1_spec = pl.BlockSpec((tk, dout_p), lambda i, k: (k, 0),
                               pipeline_mode=pl.Buffered(1))
    else:
        kernel = functools.partial(_geu_kernel_multi, normalize=normalize)
        scratch = [pltpu.VMEM((tb, dout_p), jnp.float32)]
        w1_spec = pl.BlockSpec((tk, dout_p), lambda i, k: (k, 0))

    out = pl.pallas_call(
        kernel,
        out_shape=jax.ShapeDtypeStruct((n, dout_p), out_dtype),
        grid_spec=pltpu.PrefetchScalarGridSpec(
            num_scalar_prefetch=0,
            grid=(nb, nk),
            in_specs=[
                pl.BlockSpec((tb, tk), lambda i, k: (i, k)),     # x (orig dtype, cast in-kernel)
                w1_spec,                                         # W1
                pl.BlockSpec((dout_p, dout_p), lambda i, k: (0, 0),
                             pipeline_mode=pl.Buffered(1)),      # W2 (BN folded)
                pl.BlockSpec((2, dout_p), lambda i, k: (0, 0),
                             pipeline_mode=pl.Buffered(1)),      # [b1; b2]
            ],
            out_specs=pl.BlockSpec((tb, dout_p), lambda i, k: (i, 0)),
            scratch_shapes=scratch,
        ),
        compiler_params=pltpu.CompilerParams(
            dimension_semantics=("parallel", "arbitrary"),
            vmem_limit_bytes=vmem_limit,
        ),
        cost_estimate=cost,
    )(x, w1, w2, bias)

    return out if dout_p == dout else out[:, :dout]


# ---------------------------------------------------------------------------
# Parameter init (matches nn.Linear / nn.BatchNorm1d shapes) and reference
# ---------------------------------------------------------------------------
def init_params(key, input_dim, output_dim):
    """Linear weights stored pre-transposed as (in, out)."""
    k1, k2, k3, k4 = jax.random.split(key, 4)
    bound1 = 1.0 / jnp.sqrt(input_dim)
    bound2 = 1.0 / jnp.sqrt(output_dim)
    return {
        "w1": jax.random.uniform(k1, (input_dim, output_dim), jnp.float32,
                                 -bound1, bound1),
        "b1": jax.random.uniform(k2, (1, output_dim), jnp.float32,
                                 -bound1, bound1),
        "w2": jax.random.uniform(k3, (output_dim, output_dim), jnp.float32,
                                 -bound2, bound2),
        "b2": jax.random.uniform(k4, (1, output_dim), jnp.float32,
                                 -bound2, bound2),
        # BatchNorm1d default init / running stats
        "gamma": jnp.ones((1, output_dim), jnp.float32),
        "beta": jnp.zeros((1, output_dim), jnp.float32),
        "mean": jnp.zeros((1, output_dim), jnp.float32),
        "var": jnp.ones((1, output_dim), jnp.float32),
    }


def _reference(x, p, use_bn=True, normalize=True):
    h = x @ p["w1"] + p["b1"]
    h1 = h @ p["w2"] + p["b2"]
    if use_bn:
        h1 = (h1 - p["mean"]) / jnp.sqrt(p["var"] + BN_EPS) * p["gamma"] + p["beta"]
    y = h * jax.nn.sigmoid(h1)
    if normalize:
        y = y / jnp.maximum(jnp.linalg.norm(y, axis=-1, keepdims=True), L2_EPS)
    return y


if __name__ == "__main__":
    key = jax.random.PRNGKey(0)
    kx, kp = jax.random.split(key)

    batch, input_dim, output_dim = 16, 32, 64
    x = jax.random.normal(kx, (batch, input_dim), jnp.float32)
    params = init_params(kp, input_dim, output_dim)
    ref = _reference(x, params)

    # f32 compute path: tight tolerance.
    prep_f32 = prepare_geu_params(params, use_bn=True, compute_dtype=jnp.float32)
    out_f32 = jax.block_until_ready(gated_embedding_unit(x, prep_f32, normalize=True))
    assert out_f32.shape == (batch, output_dim)
    assert jnp.allclose(out_f32, ref, atol=1e-5, rtol=1e-5), "f32 mismatch vs reference"

    # bf16 MXU path (default perf config): looser tolerance.
    prep_bf16 = prepare_geu_params(params, use_bn=True, compute_dtype=jnp.bfloat16)
    out_bf16 = jax.block_until_ready(gated_embedding_unit(x, prep_bf16, normalize=True))
    assert out_bf16.shape == (batch, output_dim)
    assert jnp.allclose(out_bf16, ref, atol=3e-2, rtol=3e-2), "bf16 mismatch vs reference"

    # Ragged batch (not a multiple of the tile) exercises Pallas block clipping.
    n_rag = 13
    out_rag = jax.block_until_ready(gated_embedding_unit(x[:n_rag], prep_f32))
    assert out_rag.shape == (n_rag, output_dim)
    assert jnp.allclose(out_rag, ref[:n_rag], atol=1e-5, rtol=1e-5), "ragged mismatch"

    print("KERNEL_OK")
</pallas_src>

<mosaic_0001>
module attributes {stable_mosaic.version = 11 : i64} {
  func.func @_geu_kernel_single(%arg0: i32, %arg1: i32, %arg2: memref<16x32xf32, #tpu.memory_space<vmem>>, %arg3: memref<32x128xf32, #tpu.memory_space<vmem>>, %arg4: memref<128x128xf32, #tpu.memory_space<vmem>>, %arg5: memref<2x128xf32, #tpu.memory_space<vmem>>, %arg6: memref<16x128xf32, #tpu.memory_space<vmem>>) attributes {dimension_semantics = [#tpu.dimension_semantics<parallel>, #tpu.dimension_semantics<arbitrary>], iteration_bounds = array<i64: 1, 1>, scalar_prefetch = 0 : i64, scratch_operands = 0 : i64, tpu.core_type = #tpu.core_type<tc>, window_params = [{transform_indices = @transform_0, window_bounds = array<i64: 16, 32>}, {pipeline_mode = #tpu.pipeline_mode<synchronous>, transform_indices = @transform_1, window_bounds = array<i64: 32, 128>}, {pipeline_mode = #tpu.pipeline_mode<synchronous>, transform_indices = @transform_2, window_bounds = array<i64: 128, 128>}, {pipeline_mode = #tpu.pipeline_mode<synchronous>, transform_indices = @transform_3, window_bounds = array<i64: 2, 128>}, {transform_indices = @transform_4, window_bounds = array<i64: 16, 128>}]} {
    %c0 = arith.constant 0 : index
    %c0_0 = arith.constant 0 : index
    %0 = vector.load %arg5[%c0, %c0_0] : memref<2x128xf32, #tpu.memory_space<vmem>>, vector<2x128xf32>
    %c0_1 = arith.constant 0 : index
    %c0_2 = arith.constant 0 : index
    %1 = vector.load %arg2[%c0_1, %c0_2] : memref<16x32xf32, #tpu.memory_space<vmem>>, vector<16x32xf32>
    %c0_3 = arith.constant 0 : index
    %c0_4 = arith.constant 0 : index
    %2 = vector.load %arg3[%c0_3, %c0_4] : memref<32x128xf32, #tpu.memory_space<vmem>>, vector<32x128xf32>
    %cst = arith.constant dense<0.000000e+00> : vector<16x128xf32>
    %3 = tpu.matmul %1, %2, %cst {dimension_numbers = #tpu.dot_dimension_numbers<[1], [0], [0], [1], [0, 0, 1, 1], [], []>} : vector<16x32xf32>, vector<32x128xf32>, vector<16x128xf32> -> vector<16x128xf32>
    %4 = vector.extract_strided_slice %0 {offsets = [0, 0], sizes = [1, 128], strides = [1, 1]} : vector<2x128xf32> to vector<1x128xf32>
    %5 = vector.broadcast %4 : vector<1x128xf32> to vector<16x128xf32>
    %6 = arith.addf %3, %5 : vector<16x128xf32>
    %c0_5 = arith.constant 0 : index
    %c0_6 = arith.constant 0 : index
    %7 = vector.load %arg4[%c0_5, %c0_6] : memref<128x128xf32, #tpu.memory_space<vmem>>, vector<128x128xf32>
    %8 = vector.extract_strided_slice %0 {offsets = [1, 0], sizes = [1, 128], strides = [1, 1]} : vector<2x128xf32> to vector<1x128xf32>
    %cst_7 = arith.constant dense<0.000000e+00> : vector<16x128xf32>
    %9 = tpu.matmul %6, %7, %cst_7 {dimension_numbers = #tpu.dot_dimension_numbers<[1], [0], [0], [1], [0, 0, 1, 1], [], []>} : vector<16x128xf32>, vector<128x128xf32>, vector<16x128xf32> -> vector<16x128xf32>
    %10 = vector.broadcast %8 : vector<1x128xf32> to vector<16x128xf32>
    %11 = arith.addf %9, %10 : vector<16x128xf32>
    %12 = arith.negf %11 : vector<16x128xf32>
    %13 = math.exp %12 : vector<16x128xf32>
    %cst_8 = arith.constant 1.000000e+00 : f32
    %14 = vector.broadcast %cst_8 : f32 to vector<16x128xf32>
    %15 = arith.addf %14, %13 : vector<16x128xf32>
    %16 = arith.divf %14, %15 : vector<16x128xf32>
    %17 = arith.mulf %6, %16 : vector<16x128xf32>
    %18 = arith.mulf %17, %17 : vector<16x128xf32>
    %cst_9 = arith.constant dense<0.000000e+00> : vector<16xf32>
    %19 = vector.multi_reduction <add>, %18, %cst_9 [1] : vector<16x128xf32> to vector<16xf32>
    %20 = vector.shape_cast %19 : vector<16xf32> to vector<16x1xf32>
    %cst_10 = arith.constant 1.000000e-24 : f32
    %21 = vector.broadcast %cst_10 : f32 to vector<16x1xf32>
    %22 = arith.maximumf %20, %21 : vector<16x1xf32>
    %23 = math.rsqrt %22 : vector<16x1xf32>
    %24 = vector.broadcast %23 : vector<16x1xf32> to vector<16x128xf32>
    %25 = arith.mulf %17, %24 : vector<16x128xf32>
    %c0_11 = arith.constant 0 : index
    %c0_12 = arith.constant 0 : index
    %26 = vector.load %arg6[%c0_11, %c0_12] : memref<16x128xf32, #tpu.memory_space<vmem>>, vector<16x128xf32>
    tpu.vector_store %arg6[%c0_11, %c0_12], %25 {strides = array<i32>} : memref<16x128xf32, #tpu.memory_space<vmem>>, vector<16x128xf32>,
    return
  }
  func.func @transform_0(%arg0: i32, %arg1: i32) -> (i32, i32) {
    %c0_i32 = arith.constant 0 : i32
    return %arg0, %arg1 : i32, i32
  }
  func.func @transform_1(%arg0: i32, %arg1: i32) -> (i32, i32) {
    %c0_i32 = arith.constant 0 : i32
    %c0_i32_0 = arith.constant 0 : i32
    return %arg1, %c0_i32 : i32, i32
  }
  func.func @transform_2(%arg0: i32, %arg1: i32) -> (i32, i32) {
    %c0_i32 = arith.constant 0 : i32
    %c0_i32_0 = arith.constant 0 : i32
    %c0_i32_1 = arith.constant 0 : i32
    return %c0_i32, %c0_i32_0 : i32, i32
  }
  func.func @transform_3(%arg0: i32, %arg1: i32) -> (i32, i32) {
    %c0_i32 = arith.constant 0 : i32
    %c0_i32_0 = arith.constant 0 : i32
    %c0_i32_1 = arith.constant 0 : i32
    return %c0_i32, %c0_i32_0 : i32, i32
  }
  func.func @transform_4(%arg0: i32, %arg1: i32) -> (i32, i32) {
    %c0_i32 = arith.constant 0 : i32
    %c0_i32_0 = arith.constant 0 : i32
    return %arg0, %c0_i32 : i32, i32
  }
}

</mosaic_0001>

<bundles_post_ra>
// kernel: tpu_custom_call.1
= control target key start
LH: loop header
LB: loop body
LE: loop exit
PB: predicated region body
PF: predicated region fallthrough
CT: control target
= control target key end

     0   :  { %9 = vsyncpa [#allocation3], 0  ;;  %s435_s0 = inlined_call_operand.hbm [shape: f32[16,32], index: 0, kind: input, shape index: {}]   ;;  %s436_s1 = inlined_call_operand.hbm [shape: f32[32,128], index: 1, kind: input, shape index: {}]   ;;  %s437_s2 = inlined_call_operand.hbm [shape: f32[128,128], index: 2, kind: input, shape index: {}]   ;;  %s438_s3 = inlined_call_operand.vmem [shape: f32[2,128], index: 3, kind: input, shape index: {}]   ;;  %s439_s4 = inlined_call_operand.hbm [shape: f32[16,128], index: 4, kind: output, shape index: {}]  }
   0x1   :  { %10 = vsyncpa [#allocation6], 0 }
   0x2   :  { %11 = vsyncpa [#allocation4], 0  ;;  %s29_s17 = sshll.u32 %s436_s1, 4  ;;  %s375_s18 = smov [#allocation5]   ;;  %s30_s17 = int_to_ptr.hbm [resolvable:$true] %s29_s17 }
   0x3   :  { %s31_s19 = sshll.u32 %s375_s18, 4  ;;  %s16_s22 = sshll.u32 %s435_s0, 4  ;;  %s32_s19 = int_to_ptr.vmem [resolvable:$true] %s31_s19  ;;  %s17_s22 = int_to_ptr.hbm [resolvable:$true] %s16_s22 }
   0x4   :  { %s376_s23 = smov 128   ;;  %s377_s24 = smov 8  }
   0x5   :  { %37 = dma.hbm_to_vmem [thread:$0]  %s30_s17, 512, %s32_s19, [#allocation6], %s376_s23, %s376_s23, %s377_s24  }
   0x6   :  { %s378_s25 = smov [#allocation2]   ;;  %s42_s1 = sshll.u32 %s437_s2, 4  ;;  %s43_s1 = int_to_ptr.hbm [resolvable:$true] %s42_s1 }
   0x7   :  { %s18_s26 = sshll.u32 %s378_s25, 4  ;;  %s379_s0 = smov [#allocation7]   ;;  %s19_s26 = int_to_ptr.vmem [resolvable:$true] %s18_s26 }
   0x8   :  { %24 = dma.hbm_to_vmem [thread:$0]  %s17_s22, 256, %s19_s26, [#allocation3], %s376_s23, %s376_s23, %s377_s24  }
   0x9   :  { %s44_s29 = sshll.u32 %s379_s0, 4  ;;  %s45_s29 = int_to_ptr.vmem [resolvable:$true] %s44_s29 }
   0xa   :  { %50 = dma.hbm_to_vmem [thread:$0]  %s43_s1, 2048, %s45_s29, [#allocation6], %s376_s23, %s376_s23, %s377_s24  }
   0xb   :  { %369 = dma.done.wait [#allocation3], 256  }
   0xc   :  { %370 = vsyncadd [#allocation3], 4294967040 }
   0xd   :  { %371 = dma.done.wait [#allocation6], 2560  }
   0xe   :  { %372 = vsyncadd [#allocation6], 4294964736  ;;  %v71_v0 = vld [vmem:[#allocation5 + $0x18] sm:$0xff]  ;;  %v70_v1 = vld [vmem:[#allocation5 + $0x10] sm:$0xff]  ;;  %vm73_vm0 = vcmask 261120   ;;  %s221_s8 = sshll.u32 %s439_s4, 4  ;;  %s222_s8 = int_to_ptr.hbm [resolvable:$true] %s221_s8 }
   0xf   :  { %92 = vmatpush.msra.mxu0 %v71_v0  ;;  %v69_v2 = vld [vmem:[#allocation5 + $0x8] sm:$0xff]  ;;  %v118_v3 = vld [vmem:[#allocation7 + $0x78] sm:$0xff]  ;;  %v117_v4 = vld [vmem:[#allocation7 + $0x70] sm:$0xff] }
  0x10   :  { %120 = vmatpush.msra.mxu1 %v118_v3  ;;  %v68_v5 = vld [vmem:[#allocation5] sm:$0xff]  ;;  %v116_v6 = vld [vmem:[#allocation7 + $0x68] sm:$0xff]  ;;  %239 = vmatpush.msra.mxu2 %v118_v3  ;;  %v66_v7 = vld [vmem:[#allocation2] sm:$0xff] }
  0x11   :  { %93 = vmatpush.msra.mxu0 %v70_v1  ;;  %v115_v8 = vld [vmem:[#allocation7 + $0x60] sm:$0xff]  ;;  %v114_v9 = vld [vmem:[#allocation7 + $0x58] sm:$0xff]  ;;  %v113_v10 = vld [vmem:[#allocation7 + $0x50] sm:$0xff] }
  0x12   :  { %121 = vmatpush.msra.mxu1 %v117_v4  ;;  %240 = vmatpush.msra.mxu2 %v117_v4  ;;  %v112_v11 = vld [vmem:[#allocation7 + $0x48] sm:$0xff]  ;;  %v67_v12 = vld [vmem:[#allocation2 + $0x8] sm:$0xff]  ;;  %v111_v13 = vld [vmem:[#allocation7 + $0x40] sm:$0xff] }
  0x13   :  { %94 = vmatpush.msra.mxu0 %v69_v2  ;;  %v110_v14 = vld [vmem:[#allocation7 + $0x38] sm:$0xff]  ;;  %v109_v15 = vld [vmem:[#allocation7 + $0x30] sm:$0xff]  ;;  %v108_v16 = vld [vmem:[#allocation7 + $0x28] sm:$0xff] }
  0x14   :  { %122 = vmatpush.msra.mxu1 %v116_v6  ;;  %241 = vmatpush.msra.mxu2 %v116_v6  ;;  %v107_v17 = vld [vmem:[#allocation7 + $0x20] sm:$0xff]  ;;  %v106_v18 = vld [vmem:[#allocation7 + $0x18] sm:$0xff]  ;;  %v105_v19 = vld [vmem:[#allocation7 + $0x10] sm:$0xff] }
  0x15   :  { %95 = vmatpush.msra.mxu0 %v68_v5  ;;  %v104_v20 = vld [vmem:[#allocation7 + $0x8] sm:$0xff]  ;;  %v103_v21 = vld [vmem:[#allocation7] sm:$0xff]  ;;  %v65_v22 = vld [vmem:[%s438_s3] sm:$0x3]  ;;  %s380_s3 = smov [#allocation8]  }
  0x16   :  { %235 = vmatmul.msk.f32.vlgmr.msra.gmra.mxu0 %vm73_vm0, %v66_v7  ;;  %123 = vmatpush.msra.mxu1 %v115_v8  ;;  %v72_v23 = vperm.slane %v65_v22, 0  ;;  %v119_v28 = vperm.slane %v65_v22, 1  ;;  %s219_s5 = sshll.u32 %s380_s3, 4  ;;  %s220_s5 = int_to_ptr.vmem [resolvable:$true] %s219_s5 }
  0x17   :  { %242 = vmatpush.msra.mxu2 %v115_v8 }
  0x18   :  { %124 = vmatpush.msra.mxu1 %v114_v9 }
  0x19   :  { %243 = vmatpush.msra.mxu2 %v114_v9 }
  0x1a   :  { %125 = vmatpush.msra.mxu1 %v113_v10 }
  0x1b   :  { %244 = vmatpush.msra.mxu2 %v113_v10 }
  0x1c   :  { %126 = vmatpush.msra.mxu1 %v112_v11 }
  0x1d   :  { %245 = vmatpush.msra.mxu2 %v112_v11 }
  0x1e   :  { %236 = vmatmul.msk.f32.gmra.mxu0 %vm73_vm0, %v67_v12  ;;  %127 = vmatpush.msra.mxu1 %v111_v13 }
  0x1f   :  { %246 = vmatpush.msra.mxu2 %v111_v13 }
  0x20   :  { %128 = vmatpush.msra.mxu1 %v110_v14 }
  0x21   :  { %247 = vmatpush.msra.mxu2 %v110_v14 }
  0x22   :  { %129 = vmatpush.msra.mxu1 %v109_v15 }
  0x23   :  { %248 = vmatpush.msra.mxu2 %v109_v15 }
  0x24   :  { %130 = vmatpush.msra.mxu1 %v108_v16 }
  0x25   :  { %249 = vmatpush.msra.mxu2 %v108_v16 }
  0x26   :  { %131 = vmatpush.msra.mxu1 %v107_v17 }
  0x27   :  { %250 = vmatpush.msra.mxu2 %v107_v17 }
  0x28   :  { %132 = vmatpush.msra.mxu1 %v106_v18 }
  0x29   :  { %251 = vmatpush.msra.mxu2 %v106_v18 }
  0x2a   :  { %133 = vmatpush.msra.mxu1 %v105_v19 }
  0x2b   :  { %252 = vmatpush.msra.mxu2 %v105_v19 }
  0x2c   :  { %134 = vmatpush.msra.mxu1 %v104_v20 }
  0x2d   :  { %253 = vmatpush.msra.mxu2 %v104_v20 }
  0x2e   :  { %135 = vmatpush.msra.mxu1 %v103_v21 }
  0x2f   :  { %254 = vmatpush.msra.mxu2 %v103_v21 }
  0x93   :  { %v97_v24 = vpop.f32.mrf.mxu0 }
  0x94   :  { %v98_v25 = vadd.f32 %v97_v24, %v72_v23 }
  0x96   :  { %136 = vmatmul.f32.vlgmr.msra.gmra.mxu1 %v98_v25 }
  0x9b   :  { %v100_v26 = vpop.f32.mrf.mxu0 }
  0x9c   :  { %v101_v27 = vadd.f32 %v100_v26, %v72_v23 }
  0x9e   :  { %139 = vmatmul.f32.vlgmr.msra.gmra.mxu2 %v101_v27 }
 0x113   :  { %v137_v29 = vpop.f32.mrf.mxu1 }
 0x114   :  { %v138_v30 = vadd.f32 %v137_v29, %v119_v28 }
 0x116   :  { %v237_v31 = vmul.f32 -1.442695, %v138_v30 }
 0x118   :  { %261 = vpow2.f32 %v237_v31 }
 0x11e   :  { %v262_v32 = vpop.eup %261 }
 0x11f   :  { %v149_v33 = vadd.f32 1.0, %v262_v32 }
 0x121   :  { %263 = vrcp.f32 %v149_v33  ;;  %v140_v34 = vpop.f32.mrf.mxu2  ;;  %v162_v40 = vand.u32 2147483648, %v149_v33  ;;  %v160_v43 = vand.u32 2147483647, %v149_v33  ;;  %vm156_vm2 = vweird.f32 %v149_v33 }
 0x122   :  { %v141_v35 = vadd.f32 %v140_v34, %v119_v28 }
 0x123   :  { %v163_v46 = vor.u32 1.1754944e-38, %v162_v40  ;;  %vm161_vm4 = vcmp.eq.f32.partialorder %v160_v43, 8.507059e+37 }
 0x124   :  { %v238_v36 = vmul.f32 -1.442695, %v141_v35 }
 0x126   :  { %265 = vpow2.f32 %v238_v36 }
 0x127   :  { %v264_v37 = vpop.eup %263 }
 0x128   :  { %v152_v38 = vmul.f32 %v264_v37, %v149_v33  ;;  %vm157_vm1 = vweird.f32 %v264_v37 }
 0x129   :  { %vm158_vm3 = vmor %vm156_vm2, %vm157_vm1 }
 0x12a   :  { %v153_v39 = vsub.f32 1.0, %v152_v38 }
 0x12c   :  { %v266_v41 = vpop.eup %265  ;;  %v154_v42 = vmul.f32 %v264_v37, %v153_v39 }
 0x12d   :  { %v150_v44 = vadd.f32 1.0, %v266_v41 }
 0x12e   :  { %v155_v45 = vadd.f32 %v264_v37, %v154_v42 }
 0x12f   :  { %267 = vrcp.f32 %v150_v44  ;;  %v177_v54 = vand.u32 2147483648, %v150_v44  ;;  %v175_v56 = vand.u32 2147483647, %v150_v44  ;;  %vm171_vm6 = vweird.f32 %v150_v44 }
 0x130   :  { %v159_v47 = vsel %vm158_vm3, %v264_v37, %v155_v45 }
 0x131   :  { %v164_v48 = vsel %vm161_vm4, %v163_v46, %v159_v47  ;;  %v178_v58 = vor.u32 1.1754944e-38, %v177_v54  ;;  %vm176_vm8 = vcmp.eq.f32.partialorder %v175_v56, 8.507059e+37 }
 0x132   :  { %v181_v49 = vmul.f32 %v164_v48, %v98_v25 }
 0x134   :  { %v183_v50 = vmul.f32 %v181_v49, %v181_v49 }
 0x135   :  { %v268_v51 = vpop.eup %267 }
 0x136   :  { %185 = vadd.xlane.f32.xlu0 %v183_v50  ;;  %v167_v52 = vmul.f32 %v268_v51, %v150_v44  ;;  %vm172_vm5 = vweird.f32 %v268_v51 }
 0x137   :  { %vm173_vm7 = vmor %vm171_vm6, %vm172_vm5 }
 0x138   :  { %v168_v53 = vsub.f32 1.0, %v167_v52 }
 0x13a   :  { %v169_v55 = vmul.f32 %v268_v51, %v168_v53 }
 0x13c   :  { %v170_v57 = vadd.f32 %v268_v51, %v169_v55 }
 0x13e   :  { %v174_v59 = vsel %vm173_vm7, %v268_v51, %v170_v57 }
 0x13f   :  { %v179_v60 = vsel %vm176_vm8, %v178_v58, %v174_v59 }
 0x140   :  { %v182_v61 = vmul.f32 %v179_v60, %v101_v27 }
 0x142   :  { %v184_v62 = vmul.f32 %v182_v61, %v182_v61 }
 0x144   :  { %187 = vadd.xlane.f32.xlu0 %v184_v62 }
 0x1a9   :  { %v186_v63 = vpop.xlane.xlu0 %185 }
 0x1aa   :  { %v189_v0 = vmax.f32 %v186_v63, 1e-24 }
 0x1ac   :  { %269 = vrsqrt.f32 %v189_v0  ;;  %vm197_vm10 = vweird.f32 %v189_v0 }
 0x1b2   :  { %v270_v1 = vpop.eup %269 }
 0x1b3   :  { %v192_v2 = vmul.f32 %v270_v1, %v189_v0  ;;  %vm198_vm9 = vweird.f32 %v270_v1 }
 0x1b4   :  { %vm199_vm11 = vmor %vm197_vm10, %vm198_vm9 }
 0x1b5   :  { %v193_v3 = vmul.f32 %v270_v1, %v192_v2 }
 0x1b7   :  { %v194_v4 = vmul.f32 0.5, %v193_v3  ;;  %v188_v5 = vpop.xlane.xlu0 %187 }
 0x1b8   :  { %v190_v6 = vmax.f32 %v188_v5, 1e-24 }
 0x1b9   :  { %v195_v7 = vsub.f32 1.5, %v194_v4 }
 0x1ba   :  { %271 = vrsqrt.f32 %v190_v6  ;;  %vm207_vm13 = vweird.f32 %v190_v6 }
 0x1bb   :  { %v196_v8 = vmul.f32 %v270_v1, %v195_v7 }
 0x1bd   :  { %v200_v9 = vsel %vm199_vm11, %v270_v1, %v196_v8 }
 0x1be   :  { %v211_v10 = vmul.f32 %v200_v9, %v181_v49 }
 0x1c0   :  { %v272_v11 = vpop.eup %271  ;;  %213 = vst [vmem:[#allocation8] sm:$0xff] %v211_v10 }
 0x1c1   :  { %v202_v12 = vmul.f32 %v272_v11, %v190_v6  ;;  %vm208_vm12 = vweird.f32 %v272_v11 }
 0x1c2   :  { %vm209_vm14 = vmor %vm207_vm13, %vm208_vm12 }
 0x1c3   :  { %v203_v13 = vmul.f32 %v272_v11, %v202_v12 }
 0x1c5   :  { %v204_v14 = vmul.f32 0.5, %v203_v13 }
 0x1c7   :  { %v205_v15 = vsub.f32 1.5, %v204_v14 }
 0x1c9   :  { %v206_v16 = vmul.f32 %v272_v11, %v205_v15 }
 0x1cb   :  { %v210_v17 = vsel %vm209_vm14, %v272_v11, %v206_v16 }
 0x1cc   :  { %v212_v18 = vmul.f32 %v210_v17, %v182_v61 }
 0x1ce   :  { %214 = vst [vmem:[#allocation8 + $0x8] sm:$0xff] %v212_v18 }
 0x1cf   :  { %227 = dma.vmem_to_hbm [thread:$0]  %s220_s5, 256, %s222_s8, [#allocation4], %s376_s23, %s376_s23, %s377_s24  }
 0x1d0   :  { %373 = dma.done.wait [#allocation4], 256  }
 0x1d1   :  { %374 = vsyncadd [#allocation4], 4294967040 }
 0x1d2   :  { %232 = vsyncpa [#allocation3], 1 }
 0x1d3   :  { %233 = vsyncpa [#allocation6], 1 }
 0x1d4   :  { %234 = vsyncpa [#allocation4], 1 }

</bundles_post_ra>
